<compile_context>
chip_gen: v7x
topology: tpu7x:2x2x1
jax: 0.10.0
libtpu: 0.0.40
codegen_flags: <defaults>
</compile_context>

<pallas_src>
import functools

import jax
import jax.numpy as jnp
from jax.experimental import pallas as pl
from jax.experimental.pallas import tpu as pltpu


def _add_timing_dropout_kernel(x_ref, m_ref, t_ref, o_ref, *, inv_keep):
    """out = where(keep_mask, x * inv_keep, 0) + timing (timing broadcast over rows)."""
    x = x_ref[...]
    kept = jnp.where(m_ref[...] != 0,
                     x * jnp.asarray(inv_keep, x.dtype),
                     jnp.zeros_like(x))
    o_ref[...] = (kept + t_ref[...]).astype(o_ref.dtype)


def _add_timing_kernel(x_ref, t_ref, o_ref):
    """out = x + timing (no input dropout)."""
    o_ref[...] = (x_ref[...] + t_ref[...]).astype(o_ref.dtype)


def _dropout_masks(rng_key, p_in, p_t, x_shape, t_shape):
    """Keep-masks matching torch.nn.Dropout semantics (True = keep)."""
    k_in, k_t = jax.random.split(rng_key)
    keep_x = jax.random.bernoulli(k_in, 1.0 - p_in, x_shape) if p_in > 0.0 else None
    keep_t = jax.random.bernoulli(k_t, 1.0 - p_t, t_shape) if p_t > 0.0 else None
    return keep_x, keep_t


def add_positional_encoding(x, timing_table, *, rng_key=None,
                            input_dropout=0.1, timing_dropout=0.1,
                            training=True, block_cols=32768):
    """Forward of AddPositionalEncoding. x: (B, T, D); timing_table: (max_len, D)."""
    B, T, D = x.shape
    max_len = timing_table.shape[0]
    assert T <= max_len, "sequence length must not exceed max_len"

    timing = timing_table[:T, :].astype(x.dtype)                   # (T, D)

    if not training:
        # Inference path: let XLA fuse the trivial add (no pallas_call overhead).
        return x + timing[None, :, :]

    p_in = float(input_dropout)
    p_t = float(timing_dropout)
    if (p_in > 0.0 or p_t > 0.0) and rng_key is None:
        raise ValueError("rng_key is required in training mode when dropout > 0")

    keep_x = keep_t = None
    if p_in > 0.0 or p_t > 0.0:
        keep_x, keep_t = _dropout_masks(rng_key, p_in, p_t, (B, T, D), (T, D))

    # Timing dropout hoisted out of the kernel (tiny, batch-shared mask).
    if keep_t is not None:
        timing = jnp.where(keep_t,
                           timing * jnp.asarray(1.0 / (1.0 - p_t), x.dtype),
                           jnp.zeros_like(timing))

    # Lane-dense 2-D layout: (B, T*D); timing broadcasts over the batch rows.
    N = T * D
    x2 = x.reshape(B, N)
    t2 = timing.reshape(1, N)

    # Tile sizes: row tile = full batch (or 8); column tile a multiple of 128,
    # capped so one f32 x-block is ~1 MiB -> deep pipeline, tiny VMEM footprint.
    row = B if B <= 8 else 8
    col = N if N <= block_cols else max(128, (block_cols // 128) * 128)
    grid = (pl.cdiv(B, row), pl.cdiv(N, col))

    compiler_params = pltpu.CompilerParams(
        dimension_semantics=("parallel", "parallel"))

    x_spec = pl.BlockSpec((row, col), lambda i, j: (i, j))
    t_spec = pl.BlockSpec((1, col), lambda i, j: (0, j))
    out_spec = pl.BlockSpec((row, col), lambda i, j: (i, j))
    out_shape = jax.ShapeDtypeStruct((B, N), x.dtype)

    # NOTE: input_output_aliases={0: 0} would remove the separate output HBM
    # allocation, but is omitted so callers may safely keep using `x` afterwards.
    if keep_x is not None:
        m2 = keep_x.reshape(B, N).astype(jnp.uint8)
        kernel = functools.partial(_add_timing_dropout_kernel,
                                   inv_keep=1.0 / (1.0 - p_in))
        out2 = pl.pallas_call(
            kernel,
            out_shape=out_shape,
            grid=grid,
            in_specs=[x_spec, x_spec, t_spec],
            out_specs=out_spec,
            compiler_params=compiler_params,
        )(x2, m2, t2)
    else:
        out2 = pl.pallas_call(
            _add_timing_kernel,
            out_shape=out_shape,
            grid=grid,
            in_specs=[x_spec, t_spec],
            out_specs=out_spec,
            compiler_params=compiler_params,
        )(x2, t2)

    return out2.reshape(B, T, D)


if __name__ == "__main__":
    # Deterministic synthetic parameters / inputs (no checkpoint).
    d_model = 128          # small but lane-dense (module default is 256)
    max_len = 64
    B, T = 4, 8
    p_in = p_t = 0.1

    key = jax.random.PRNGKey(0)
    k_table, k_x, k_drop = jax.random.split(key, 3)
    timing_table = jax.random.normal(k_table, (max_len, d_model), jnp.float32)
    x = jax.random.normal(k_x, (B, T, d_model), jnp.float32)
    timing = timing_table[:T, :]

    # --- training-mode forward (dropout active), default column tile ---------
    out_train = add_positional_encoding(
        x, timing_table, rng_key=k_drop,
        input_dropout=p_in, timing_dropout=p_t, training=True)
    jax.block_until_ready(out_train)

    # Exact reference: regenerate the same keep-masks with the same key logic.
    keep_x, keep_t = _dropout_masks(k_drop, p_in, p_t, (B, T, d_model), (T, d_model))
    ref_train = (jnp.where(keep_x, x / (1.0 - p_in), 0.0)
                 + jnp.where(keep_t, timing / (1.0 - p_t), 0.0)[None, :, :])
    assert out_train.shape == (B, T, d_model)
    assert jnp.allclose(out_train, ref_train, atol=1e-5, rtol=1e-5), \
        "training-mode mismatch"

    # --- same thing with a small column tile to exercise the multi-block grid -
    out_tiled = add_positional_encoding(
        x, timing_table, rng_key=k_drop,
        input_dropout=p_in, timing_dropout=p_t, training=True, block_cols=256)
    jax.block_until_ready(out_tiled)
    assert jnp.allclose(out_tiled, ref_train, atol=1e-5, rtol=1e-5), \
        "tiled training-mode mismatch"

    # --- training mode with dropout disabled (pure in-kernel add path) -------
    out_nodrop = add_positional_encoding(
        x, timing_table, rng_key=k_drop,
        input_dropout=0.0, timing_dropout=0.0, training=True)
    jax.block_until_ready(out_nodrop)
    assert jnp.allclose(out_nodrop, x + timing[None, :, :], atol=1e-6), \
        "no-dropout mismatch"

    # --- eval mode (identity dropouts, plain fused add) -----------------------
    out_eval = add_positional_encoding(x, timing_table, training=False)
    jax.block_until_ready(out_eval)
    assert jnp.allclose(out_eval, x + timing[None, :, :], atol=1e-6), \
        "eval-mode mismatch"

    print("KERNEL_OK")
</pallas_src>

<mosaic_0001>
module attributes {stable_mosaic.version = 11 : i64} {
  func.func @_add_timing_dropout_kernel(%arg0: i32, %arg1: i32, %arg2: memref<4x1024xf32, #tpu.memory_space<vmem>>, %arg3: memref<4x1024xi8, #tpu.memory_space<vmem>>, %arg4: memref<1x1024xf32, #tpu.memory_space<vmem>>, %arg5: memref<4x1024xf32, #tpu.memory_space<vmem>>) attributes {dimension_semantics = [#tpu.dimension_semantics<parallel>, #tpu.dimension_semantics<parallel>], iteration_bounds = array<i64: 1, 1>, scalar_prefetch = 0 : i64, scratch_operands = 0 : i64, tpu.core_type = #tpu.core_type<tc>, window_params = [{transform_indices = @transform_0, window_bounds = array<i64: 4, 1024>}, {transform_indices = @transform_1, window_bounds = array<i64: 4, 1024>}, {transform_indices = @transform_2, window_bounds = array<i64: 1, 1024>}, {transform_indices = @transform_3, window_bounds = array<i64: 4, 1024>}]} {
    %c0 = arith.constant 0 : index
    %c0_0 = arith.constant 0 : index
    %0 = vector.load %arg2[%c0, %c0_0] : memref<4x1024xf32, #tpu.memory_space<vmem>>, vector<4x1024xf32>
    %c0_1 = arith.constant 0 : index
    %c0_2 = arith.constant 0 : index
    %1 = vector.load %arg3[%c0_1, %c0_2] : memref<4x1024xi8, #tpu.memory_space<vmem>>, vector<4x1024xi8>
    %c0_i8 = arith.constant 0 : i8
    %2 = vector.broadcast %c0_i8 : i8 to vector<4x1024xi8>
    %3 = arith.cmpi ne, %1, %2 : vector<4x1024xi8>
    %cst = arith.constant 1.11111116 : f32
    %4 = vector.broadcast %cst : f32 to vector<4x1024xf32>
    %5 = arith.mulf %0, %4 : vector<4x1024xf32>
    %cst_3 = arith.constant 0.000000e+00 : f32
    %6 = vector.broadcast %cst_3 : f32 to vector<4x1024xf32>
    %7 = arith.select %3, %5, %6 : vector<4x1024xi1>, vector<4x1024xf32>
    %c0_4 = arith.constant 0 : index
    %c0_5 = arith.constant 0 : index
    %8 = vector.load %arg4[%c0_4, %c0_5] : memref<1x1024xf32, #tpu.memory_space<vmem>>, vector<1x1024xf32>
    %9 = vector.broadcast %8 : vector<1x1024xf32> to vector<4x1024xf32>
    %10 = arith.addf %7, %9 : vector<4x1024xf32>
    %c0_6 = arith.constant 0 : index
    %c0_7 = arith.constant 0 : index
    %11 = vector.load %arg5[%c0_6, %c0_7] : memref<4x1024xf32, #tpu.memory_space<vmem>>, vector<4x1024xf32>
    tpu.vector_store %arg5[%c0_6, %c0_7], %10 {strides = array<i32>} : memref<4x1024xf32, #tpu.memory_space<vmem>>, vector<4x1024xf32>,
    return
  }
  func.func @transform_0(%arg0: i32, %arg1: i32) -> (i32, i32) {
    %c0_i32 = arith.constant 0 : i32
    return %arg0, %arg1 : i32, i32
  }
  func.func @transform_1(%arg0: i32, %arg1: i32) -> (i32, i32) {
    %c0_i32 = arith.constant 0 : i32
    return %arg0, %arg1 : i32, i32
  }
  func.func @transform_2(%arg0: i32, %arg1: i32) -> (i32, i32) {
    %c0_i32 = arith.constant 0 : i32
    %c0_i32_0 = arith.constant 0 : i32
    return %c0_i32, %arg1 : i32, i32
  }
  func.func @transform_3(%arg0: i32, %arg1: i32) -> (i32, i32) {
    %c0_i32 = arith.constant 0 : i32
    return %arg0, %arg1 : i32, i32
  }
}

</mosaic_0001>

<bundles_post_ra>
// kernel: tpu_custom_call.1
= control target key start
LH: loop header
LB: loop body
LE: loop exit
PB: predicated region body
PF: predicated region fallthrough
CT: control target
= control target key end

     0   :  { %8 = vsyncpa [#allocation3], 0  ;;  %s313_s0 = inlined_call_operand.hbm [shape: f32[4,1024], index: 0, kind: input, shape index: {}]   ;;  %s314_s1 = inlined_call_operand.hbm [shape: u8[4,1024], index: 1, kind: input, shape index: {}]   ;;  %s315_s2 = inlined_call_operand.hbm [shape: f32[1,1024], index: 2, kind: input, shape index: {}]   ;;  %s316_s3 = inlined_call_operand.hbm [shape: f32[4,1024], index: 3, kind: output, shape index: {}]  }
   0x1   :  { %9 = vsyncpa [#allocation6], 0 }
   0x2   :  { %10 = vsyncpa [#allocation4], 0  ;;  %s240_s12 = smov [#allocation5]   ;;  %s241_s14 = smov [#allocation2]  }
   0x3   :  { %s27_s13 = sshll.u32 %s240_s12, 4  ;;  %s17_s15 = sshll.u32 %s241_s14, 4  ;;  %s28_s13 = int_to_ptr.vmem [resolvable:$true] %s27_s13  ;;  %s18_s15 = int_to_ptr.vmem [resolvable:$true] %s17_s15 }
   0x4   :  { %s146_s18 = scalar_lea.hbm %s314_s1, 128 }
   0x5   :  { %p147_p0 = scmp.ne.s32.totalorder %s314_s1, %s146_s18  ;;  %p150_p1 = scmp.lt.u32.totalorder %s146_s18, %s314_s1 }
   0x7   :  { %p152_p2 = pnand %p150_p1, %p147_p0 }
   0x9   :  { %155 = shalt.err (!%p152_p2)
}
   0xa   :  { %s156_s23 = scalar_lea.vmem %s28_s13, 128  ;;  %p161_p4 = scmp.lt.s32.totalorder %s28_s13, %s28_s13 }
   0xb   :  { %p157_p3 = scmp.ne.s32.totalorder %s28_s13, %s156_s23  ;;  %p162_p5 = scmp.lt.s32.totalorder %s156_s23, %s156_s23 }
   0xd   :  { %p163_p6 = por %p162_p5, %p161_p4 }
   0xf   :  { %p164_p7 = pnand %p163_p6, %p157_p3 }
  0x11   :  { %167 = shalt.err (!%p164_p7)
}
  0x12   :  { %30 = dma.hbm_to_vmem [thread:$0]  %s314_s1, 128, %s28_s13, [#allocation6]  }
  0x13   :  { %s168_s28 = scalar_lea.hbm %s313_s0, 512 }
  0x14   :  { %p169_p8 = scmp.ne.s32.totalorder %s313_s0, %s168_s28  ;;  %p172_p9 = scmp.lt.u32.totalorder %s168_s28, %s313_s0 }
  0x16   :  { %p174_p10 = pnand %p172_p9, %p169_p8 }
  0x18   :  { %177 = shalt.err (!%p174_p10)
}
  0x19   :  { %s178_s6 = scalar_lea.vmem %s18_s15, 512  ;;  %p183_p12 = scmp.lt.s32.totalorder %s18_s15, %s18_s15 }
  0x1a   :  { %p179_p11 = scmp.ne.s32.totalorder %s18_s15, %s178_s6  ;;  %p184_p13 = scmp.lt.s32.totalorder %s178_s6, %s178_s6 }
  0x1c   :  { %p185_p0 = por %p184_p13, %p183_p12 }
  0x1e   :  { %p186_p1 = pnand %p185_p0, %p179_p11 }
  0x20   :  { %189 = shalt.err (!%p186_p1)
}
  0x21   :  { %20 = dma.hbm_to_vmem [thread:$0]  %s313_s0, 512, %s18_s15, [#allocation3]  }
  0x22   :  { %s242_s8 = smov [#allocation7]   ;;  %s190_s12 = scalar_lea.hbm %s315_s2, 128 }
  0x23   :  { %s37_s9 = sshll.u32 %s242_s8, 4  ;;  %p191_p2 = scmp.ne.s32.totalorder %s315_s2, %s190_s12  ;;  %s38_s9 = int_to_ptr.vmem [resolvable:$true] %s37_s9 }
  0x24   :  { %p194_p3 = scmp.lt.u32.totalorder %s190_s12, %s315_s2 }
  0x26   :  { %p196_p4 = pnand %p194_p3, %p191_p2 }
  0x28   :  { %199 = shalt.err (!%p196_p4)
}
  0x29   :  { %s200_s18 = scalar_lea.vmem %s38_s9, 128  ;;  %p205_p6 = scmp.lt.s32.totalorder %s38_s9, %s38_s9 }
  0x2a   :  { %p201_p5 = scmp.ne.s32.totalorder %s38_s9, %s200_s18  ;;  %p206_p7 = scmp.lt.s32.totalorder %s200_s18, %s200_s18 }
  0x2c   :  { %p207_p8 = por %p206_p7, %p205_p6 }
  0x2e   :  { %p208_p9 = pnand %p207_p8, %p201_p5 }
  0x30   :  { %211 = shalt.err (!%p208_p9)
}
  0x31   :  { %40 = dma.hbm_to_vmem [thread:$0]  %s315_s2, 128, %s38_s9, [#allocation6]  }
  0x32   :  { %234 = dma.done.wait [#allocation3], 512  }
  0x33   :  { %235 = vsyncadd [#allocation3], 4294966784 }
  0x34   :  { %236 = dma.done.wait [#allocation6], 256  }
  0x35   :  { %237 = vsyncadd [#allocation6], 4294967040  ;;  %v77_v0 = vlaneseq  ;;  %v52_v7 = vld [vmem:[#allocation2] sm:$0xff]  ;;  %v75_v9 = vld [vmem:[#allocation7] sm:$0xff]  ;;  %v243_v18 = vmov 0   ;;  %s244_s2 = smov [#allocation8]  }
  0x36   :  { %v56_v8 = vld [vmem:[#allocation5] sm:$0xff]  ;;  %v58_v13 = vmul.f32 1.1111112, %v52_v7  ;;  %v53_v16 = vld [vmem:[#allocation2 + $0x8] sm:$0xff]  ;;  %v54_v17 = vld [vmem:[#allocation2 + $0x10] sm:$0xff]  ;;  %s131_s19 = sshll.u32 %s244_s2, 4  ;;  %s132_s19 = int_to_ptr.vmem [resolvable:$true] %s131_s19 }
  0x37   :  { %v78_v1 = vshrl.u32 %v77_v0, 7  ;;  %vm57_vm0 = vnez %v56_v8  ;;  %v59_v20 = vmul.f32 1.1111112, %v53_v16  ;;  %v55_v23 = vld [vmem:[#allocation2 + $0x18] sm:$0xff]  ;;  %v60_v27 = vmul.f32 1.1111112, %v54_v17  ;;  %p217_p11 = scmp.lt.s32.totalorder %s132_s19, %s132_s19 }
  0x38   :  { %v62_v19 = vsel %vm57_vm0, 16843009, %v243_v18  ;;  %v61_v32 = vmul.f32 1.1111112, %v55_v23  ;;  %s212_s20 = scalar_lea.vmem %s132_s19, 512 }
  0x39   :  { %v79_v2 = vsub.s32 0, %v78_v1  ;;  %v83_v3 = vsub.s32 1, %v78_v1  ;;  %v87_v4 = vsub.s32 2, %v78_v1  ;;  %v91_v5 = vsub.s32 3, %v78_v1  ;;  %p213_p10 = scmp.ne.s32.totalorder %s132_s19, %s212_s20  ;;  %p218_p12 = scmp.lt.s32.totalorder %s212_s20, %s212_s20 }
  0x3a   :  { %v95_v6 = vsub.s32 4, %v78_v1  ;;  %v99_v10 = vsub.s32 5, %v78_v1  ;;  %v103_v11 = vsub.s32 6, %v78_v1  ;;  %v107_v12 = vsub.s32 7, %v78_v1 }
  0x3b   :  { %v80_v14 = vrot.slane %v75_v9, %v79_v2  ;;  %v84_v15 = vrot.slane %v75_v9, %v83_v3  ;;  %v88_v21 = vrot.slane %v75_v9, %v87_v4  ;;  %v92_v22 = vrot.slane %v75_v9, %v91_v5  ;;  %p219_p13 = por %p218_p12, %p217_p11 }
  0x3c   :  { %v63_v24 = vunpack.c.0.s8 %v62_v19  ;;  %v64_v26 = vunpack.c.1.s8 %v62_v19  ;;  %v65_v29 = vunpack.c.2.s8 %v62_v19  ;;  %v96_v30 = vrot.slane %v75_v9, %v95_v6 }
  0x3d   :  { %v109_v25 = vcombine.low %v80_v14, %v84_v15  ;;  %v110_v28 = vcombine.low %v88_v21, %v92_v22  ;;  %v100_v31 = vrot.slane %v75_v9, %v99_v10  ;;  %v66_v33 = vunpack.c.3.s8 %v62_v19  ;;  %p220_p0 = pnand %p219_p13, %p213_p10 }
  0x3e   :  { %vm67_vm1 = vcmp.ne.s32.totalorder %v63_v24, 0  ;;  %vm68_vm2 = vcmp.ne.s32.totalorder %v64_v26, 0  ;;  %vm69_vm3 = vcmp.ne.s32.totalorder %v65_v29, 0  ;;  %v104_v41 = vrot.slane %v75_v9, %v103_v11 }
  0x3f   :  { %v71_v34 = vsel %vm67_vm1, %v58_v13, 0.0  ;;  %v72_v35 = vsel %vm68_vm2, %v59_v20, 0.0  ;;  %v111_v36 = vcombine.low %v96_v30, %v100_v31  ;;  %v73_v39 = vsel %vm69_vm3, %v60_v27, 0.0 }
  0x40   :  { %v117_v37 = vadd.f32 %v109_v25, %v71_v34  ;;  %v118_v38 = vadd.f32 %v110_v28, %v72_v35  ;;  %vm70_vm4 = vcmp.ne.s32.totalorder %v66_v33, 0  ;;  %v108_v42 = vrot.slane %v75_v9, %v107_v12 }
  0x41   :  { %v119_v40 = vadd.f32 %v111_v36, %v73_v39  ;;  %v74_v43 = vsel %vm70_vm4, %v61_v32, 0.0 }
  0x42   :  { %121 = vst [vmem:[#allocation8] sm:$0xff] %v117_v37  ;;  %122 = vst [vmem:[#allocation8 + $0x8] sm:$0xff] %v118_v38  ;;  %v112_v44 = vcombine.low %v104_v41, %v108_v42 }
  0x43   :  { %123 = vst [vmem:[#allocation8 + $0x10] sm:$0xff] %v119_v40 }
  0x44   :  { %v120_v45 = vadd.f32 %v112_v44, %v74_v43 }
  0x46   :  { %124 = vst [vmem:[#allocation8 + $0x18] sm:$0xff] %v120_v45 }
  0x47   :  { %223 = shalt.err (!%p220_p0)
}
  0x48   :  { %s224_s23 = scalar_lea.hbm %s316_s3, 512 }
  0x49   :  { %p225_p1 = scmp.ne.s32.totalorder %s316_s3, %s224_s23  ;;  %p228_p2 = scmp.lt.u32.totalorder %s224_s23, %s316_s3 }
  0x4b   :  { %p230_p3 = pnand %p228_p2, %p225_p1 }
  0x4d   :  { %233 = shalt.err (!%p230_p3)
}
  0x4e   :  { %134 = dma.vmem_to_hbm [thread:$0]  %s132_s19, 512, %s316_s3, [#allocation4]  }
  0x4f   :  { %238 = dma.done.wait [#allocation4], 512  }
  0x50   :  { %239 = vsyncadd [#allocation4], 4294966784 }
  0x51   :  { %138 = vsyncpa [#allocation3], 1 }
  0x52   :  { %139 = vsyncpa [#allocation6], 1 }
  0x53   :  { %140 = vsyncpa [#allocation4], 1 }

</bundles_post_ra>
